<compile_context>
chip_gen: v7x
topology: tpu7x:2x2x1
jax: 0.10.0
libtpu: 0.0.40
codegen_flags: <defaults>
</compile_context>

<pallas_src>
import functools

import jax
import jax.numpy as jnp
from jax.experimental import pallas as pl
from jax.experimental.pallas import tpu as pltpu

# ---- f32 sincos constants ---------------------------------------------------
_INV_PIO2 = 0.6366197723675814          # 2/pi
_PIO2_HI = 1.5707855224609375           # pi/2 high part (15 mantissa bits, exact in f32)
_PIO2_MID = 1.0804333959119e-05         # pi/2 - _PIO2_HI
# cephes single-precision minimax coefficients, valid on |r| <= pi/4
_S1, _S2, _S3 = -1.6666654611e-1, 8.3321608736e-3, -1.9515295891e-4
_C1, _C2, _C3 = 4.166664568298827e-2, -1.388731625493765e-3, 2.443315711809948e-5


def _fourier_kernel(x_ref, bt_ref, out_ref, *, mapping_size):
    # x_ref  : (tile_n, 1) f32  input coordinates
    # bt_ref : (1, M)      f32  2*pi*B.T (grid-resident, constant index_map)
    # out_ref: (tile_n, 2M)     [sin(t) | cos(t)]
    M = mapping_size
    x = x_ref[...].astype(jnp.float32)                 # (tile_n, 1)
    t = x * bt_ref[...]                                # (tile_n, M) VPU broadcast mul

    # Shared range reduction: t = n*(pi/2) + r, |r| <= pi/4 (done ONCE for sin & cos).
    n = jnp.floor(t * _INV_PIO2 + 0.5)
    r = (t - n * _PIO2_HI) - n * _PIO2_MID
    r2 = r * r

    # Minimax polynomials on the reduced argument.
    sin_r = r + r * r2 * (_S1 + r2 * (_S2 + r2 * _S3))
    cos_r = 1.0 - 0.5 * r2 + (r2 * r2) * (_C1 + r2 * (_C2 + r2 * _C3))

    # Quadrant fix-up from the low bits of n (two's complement handles n < 0).
    q = n.astype(jnp.int32)
    odd = (q & 1) != 0
    sin_t = jnp.where(odd, cos_r, sin_r)
    cos_t = jnp.where(odd, sin_r, cos_r)
    sin_t = jnp.where((q & 2) != 0, -sin_t, sin_t)
    cos_t = jnp.where(((q + 1) & 2) != 0, -cos_t, cos_t)

    # Two half-width stores (lane-dense when M % 128 == 0; cheap regardless,
    # since the kernel is VALU-bound: ~10+ cycles of polynomial work per vreg).
    out_ref[:, :M] = sin_t.astype(out_ref.dtype)
    out_ref[:, M:] = cos_t.astype(out_ref.dtype)


def _round_up(a, b):
    return ((a + b - 1) // b) * b


def fourier_features(x, B, *, tile_n=None, out_dtype=None):
    """x: (N, 1) float; B: (mapping_size, 1) float -> (N, 2*mapping_size).

    out[:, :M] = sin(2*pi*x @ B.T),  out[:, M:] = cos(2*pi*x @ B.T)
    """
    N, one = x.shape
    assert one == 1, "FourierFeatures expects trailing dim of size 1"
    M = int(B.shape[0])
    out_dtype = jnp.dtype(out_dtype) if out_dtype is not None else jnp.dtype(x.dtype)
    # On bandwidth-bound v5e/v6e, pass out_dtype=jnp.bfloat16 (argument math stays f32).

    # Host/XLA-side precompute: fold 2*pi into B.T -> single resident (1, M) operand.
    bt = (2.0 * jnp.pi) * B.astype(jnp.float32).reshape(1, M)

    # ---- Tile sizing: output-byte budget + VMEM cap + >=4 grid steps --------
    lanes_out = _round_up(2 * M, 128)
    out_row = lanes_out * out_dtype.itemsize       # out block bytes/row (lane-padded)
    x_row = 128 * 4                                # (tile_n, 1) f32 block pads lanes to 128
    interm_row = 6 * _round_up(M, 128) * 4         # live f32 intermediates (t, r, polys, q, ...)
    per_row = 2 * (out_row + x_row) + interm_row   # double-buffered I/O + intermediates

    if tile_n is None:
        tile_n = (4 << 20) // out_row              # ~4 MiB of output per grid step
    tile_n = max(8, (int(tile_n) // 8) * 8)
    # ~24 MiB budget for pipeline buffers + intermediates (safe on v7x's 64 MiB VMEM).
    tile_n = min(tile_n, max(8, ((24 << 20) // per_row) // 8 * 8))
    # Keep >= 4 grid steps when possible: hides DMA behind compute and lets the
    # parallel axis split across the 2 TensorCores on v7x.
    if N >= 4 * 8:
        tile_n = min(tile_n, max(8, (N // 4 // 8) * 8))
    tile_n = min(tile_n, _round_up(N, 8))

    grid = (pl.cdiv(N, tile_n),)                   # non-divisible grid: last block is masked

    vmem_limit = int(min(max(per_row * tile_n + (6 << 20), 16 << 20), 44 << 20))

    kernel = functools.partial(_fourier_kernel, mapping_size=M)
    return pl.pallas_call(
        kernel,
        out_shape=jax.ShapeDtypeStruct((N, 2 * M), out_dtype),
        grid_spec=pltpu.PrefetchScalarGridSpec(
            num_scalar_prefetch=0,
            grid=grid,
            in_specs=[
                pl.BlockSpec((tile_n, 1), lambda i: (i, 0)),   # x row tile
                pl.BlockSpec((1, M), lambda i: (0, 0)),        # 2*pi*B.T (resident)
            ],
            out_specs=pl.BlockSpec((tile_n, 2 * M), lambda i: (i, 0)),
        ),
        compiler_params=pltpu.CompilerParams(
            dimension_semantics=("parallel",),
            vmem_limit_bytes=vmem_limit,
        ),
    )(x, bt)


if __name__ == "__main__":
    key = jax.random.PRNGKey(0)
    k_b, k_x = jax.random.split(key)

    scale = 10.0
    mapping_size = 64        # 2*M = 128 -> lane-dense output block
    N = 200                  # not tile-aligned: exercises the masked last block

    # Deterministic "parameter" B = scale * randn((mapping_size, 1)).
    B = scale * jax.random.normal(k_b, (mapping_size, 1), dtype=jnp.float32)
    x = jax.random.normal(k_x, (N, 1), dtype=jnp.float32)

    out = fourier_features(x, B)
    out = jax.block_until_ready(out)

    # Pure-JAX reference (direct module formula).
    x_proj = jnp.matmul(2.0 * jnp.pi * x, B.T)
    ref = jnp.concatenate([jnp.sin(x_proj), jnp.cos(x_proj)], axis=-1)

    # Tolerance note: with scale=10 the arguments reach several hundred radians,
    # so f32 rounding of the argument (2*pi folded into B vs folded into x)
    # dominates the mismatch (~1e-4); polynomial error is ~1e-6.
    assert out.shape == (N, 2 * mapping_size)
    assert jnp.allclose(out, ref, atol=2e-3, rtol=0.0)

    print("KERNEL_OK")
</pallas_src>

<mosaic_0001>
module attributes {stable_mosaic.version = 11 : i64} {
  func.func @_fourier_kernel(%arg0: i32, %arg1: memref<48x1xf32, #tpu.memory_space<vmem>>, %arg2: memref<1x64xf32, #tpu.memory_space<vmem>>, %arg3: memref<48x128xf32, #tpu.memory_space<vmem>>) attributes {dimension_semantics = [#tpu.dimension_semantics<parallel>], iteration_bounds = array<i64: 5>, scalar_prefetch = 0 : i64, scratch_operands = 0 : i64, tpu.core_type = #tpu.core_type<tc>, window_params = [{transform_indices = @transform_0, window_bounds = array<i64: 48, 1>}, {pipeline_mode = #tpu.pipeline_mode<synchronous>, transform_indices = @transform_1, window_bounds = array<i64: 1, 64>}, {transform_indices = @transform_2, window_bounds = array<i64: 48, 128>}]} {
    %c0 = arith.constant 0 : index
    %c0_0 = arith.constant 0 : index
    %0 = vector.load %arg1[%c0, %c0_0] : memref<48x1xf32, #tpu.memory_space<vmem>>, vector<48x1xf32>
    %c0_1 = arith.constant 0 : index
    %c0_2 = arith.constant 0 : index
    %1 = vector.load %arg2[%c0_1, %c0_2] : memref<1x64xf32, #tpu.memory_space<vmem>>, vector<1x64xf32>
    %2 = vector.broadcast %0 : vector<48x1xf32> to vector<48x64xf32>
    %3 = vector.broadcast %1 : vector<1x64xf32> to vector<48x64xf32>
    %4 = arith.mulf %2, %3 : vector<48x64xf32>
    %cst = arith.constant 0.636619746 : f32
    %5 = vector.broadcast %cst : f32 to vector<48x64xf32>
    %6 = arith.mulf %4, %5 : vector<48x64xf32>
    %cst_3 = arith.constant 5.000000e-01 : f32
    %7 = vector.broadcast %cst_3 : f32 to vector<48x64xf32>
    %8 = arith.addf %6, %7 : vector<48x64xf32>
    %9 = math.floor %8 : vector<48x64xf32>
    %cst_4 = arith.constant 1.57078552 : f32
    %10 = vector.broadcast %cst_4 : f32 to vector<48x64xf32>
    %11 = arith.mulf %9, %10 : vector<48x64xf32>
    %12 = arith.subf %4, %11 : vector<48x64xf32>
    %cst_5 = arith.constant 1.08043341E-5 : f32
    %13 = vector.broadcast %cst_5 : f32 to vector<48x64xf32>
    %14 = arith.mulf %9, %13 : vector<48x64xf32>
    %15 = arith.subf %12, %14 : vector<48x64xf32>
    %16 = arith.mulf %15, %15 : vector<48x64xf32>
    %17 = arith.mulf %15, %16 : vector<48x64xf32>
    %cst_6 = arith.constant -1.95152956E-4 : f32
    %18 = vector.broadcast %cst_6 : f32 to vector<48x64xf32>
    %19 = arith.mulf %16, %18 : vector<48x64xf32>
    %cst_7 = arith.constant 0.00833216123 : f32
    %20 = vector.broadcast %cst_7 : f32 to vector<48x64xf32>
    %21 = arith.addf %20, %19 : vector<48x64xf32>
    %22 = arith.mulf %16, %21 : vector<48x64xf32>
    %cst_8 = arith.constant -0.166666552 : f32
    %23 = vector.broadcast %cst_8 : f32 to vector<48x64xf32>
    %24 = arith.addf %23, %22 : vector<48x64xf32>
    %25 = arith.mulf %17, %24 : vector<48x64xf32>
    %26 = arith.addf %15, %25 : vector<48x64xf32>
    %cst_9 = arith.constant 5.000000e-01 : f32
    %27 = vector.broadcast %cst_9 : f32 to vector<48x64xf32>
    %28 = arith.mulf %27, %16 : vector<48x64xf32>
    %cst_10 = arith.constant 1.000000e+00 : f32
    %29 = vector.broadcast %cst_10 : f32 to vector<48x64xf32>
    %30 = arith.subf %29, %28 : vector<48x64xf32>
    %31 = arith.mulf %16, %16 : vector<48x64xf32>
    %cst_11 = arith.constant 2.44331568E-5 : f32
    %32 = vector.broadcast %cst_11 : f32 to vector<48x64xf32>
    %33 = arith.mulf %16, %32 : vector<48x64xf32>
    %cst_12 = arith.constant -0.00138873165 : f32
    %34 = vector.broadcast %cst_12 : f32 to vector<48x64xf32>
    %35 = arith.addf %34, %33 : vector<48x64xf32>
    %36 = arith.mulf %16, %35 : vector<48x64xf32>
    %cst_13 = arith.constant 0.0416666456 : f32
    %37 = vector.broadcast %cst_13 : f32 to vector<48x64xf32>
    %38 = arith.addf %37, %36 : vector<48x64xf32>
    %39 = arith.mulf %31, %38 : vector<48x64xf32>
    %40 = arith.addf %30, %39 : vector<48x64xf32>
    %41 = arith.fptosi %9 : vector<48x64xf32> to vector<48x64xi32>
    %c1_i32 = arith.constant 1 : i32
    %42 = vector.broadcast %c1_i32 : i32 to vector<48x64xi32>
    %43 = arith.andi %41, %42 : vector<48x64xi32>
    %c0_i32 = arith.constant 0 : i32
    %44 = vector.broadcast %c0_i32 : i32 to vector<48x64xi32>
    %45 = arith.cmpi ne, %43, %44 : vector<48x64xi32>
    %46 = arith.select %45, %40, %26 : vector<48x64xi1>, vector<48x64xf32>
    %47 = arith.select %45, %26, %40 : vector<48x64xi1>, vector<48x64xf32>
    %c2_i32 = arith.constant 2 : i32
    %48 = vector.broadcast %c2_i32 : i32 to vector<48x64xi32>
    %49 = arith.andi %41, %48 : vector<48x64xi32>
    %c0_i32_14 = arith.constant 0 : i32
    %50 = vector.broadcast %c0_i32_14 : i32 to vector<48x64xi32>
    %51 = arith.cmpi ne, %49, %50 : vector<48x64xi32>
    %cst_15 = arith.constant 0.000000e+00 : f32
    %52 = vector.broadcast %cst_15 : f32 to vector<48x64xf32>
    %53 = arith.subf %52, %46 : vector<48x64xf32>
    %54 = arith.select %51, %53, %46 : vector<48x64xi1>, vector<48x64xf32>
    %c1_i32_16 = arith.constant 1 : i32
    %55 = vector.broadcast %c1_i32_16 : i32 to vector<48x64xi32>
    %56 = arith.addi %41, %55 : vector<48x64xi32>
    %c2_i32_17 = arith.constant 2 : i32
    %57 = vector.broadcast %c2_i32_17 : i32 to vector<48x64xi32>
    %58 = arith.andi %56, %57 : vector<48x64xi32>
    %c0_i32_18 = arith.constant 0 : i32
    %59 = vector.broadcast %c0_i32_18 : i32 to vector<48x64xi32>
    %60 = arith.cmpi ne, %58, %59 : vector<48x64xi32>
    %cst_19 = arith.constant 0.000000e+00 : f32
    %61 = vector.broadcast %cst_19 : f32 to vector<48x64xf32>
    %62 = arith.subf %61, %47 : vector<48x64xf32>
    %63 = arith.select %60, %62, %47 : vector<48x64xi1>, vector<48x64xf32>
    %c0_20 = arith.constant 0 : index
    %c0_21 = arith.constant 0 : index
    %64 = vector.load %arg3[%c0_20, %c0_21] : memref<48x128xf32, #tpu.memory_space<vmem>>, vector<48x64xf32>
    tpu.vector_store %arg3[%c0_20, %c0_21], %54 {strides = array<i32>} : memref<48x128xf32, #tpu.memory_space<vmem>>, vector<48x64xf32>,
    %c0_22 = arith.constant 0 : index
    %c64 = arith.constant 64 : index
    %65 = vector.load %arg3[%c0_22, %c64] : memref<48x128xf32, #tpu.memory_space<vmem>>, vector<48x64xf32>
    tpu.vector_store %arg3[%c0_22, %c64], %63 {strides = array<i32>} : memref<48x128xf32, #tpu.memory_space<vmem>>, vector<48x64xf32>,
    return
  }
  func.func @transform_0(%arg0: i32) -> (i32, i32) {
    %c0_i32 = arith.constant 0 : i32
    %c0_i32_0 = arith.constant 0 : i32
    return %arg0, %c0_i32 : i32, i32
  }
  func.func @transform_1(%arg0: i32) -> (i32, i32) {
    %c0_i32 = arith.constant 0 : i32
    %c0_i32_0 = arith.constant 0 : i32
    %c0_i32_1 = arith.constant 0 : i32
    return %c0_i32, %c0_i32_0 : i32, i32
  }
  func.func @transform_2(%arg0: i32) -> (i32, i32) {
    %c0_i32 = arith.constant 0 : i32
    %c0_i32_0 = arith.constant 0 : i32
    return %arg0, %c0_i32 : i32, i32
  }
}

</mosaic_0001>

<bundles_post_ra>
// kernel: tpu_custom_call.1
= control target key start
LH: loop header
LB: loop body
LE: loop exit
PB: predicated region body
PF: predicated region fallthrough
CT: control target
= control target key end

     0   :  { %7 = vsyncpa [#allocation3], 0  ;;  %s1067_s0 = inlined_call_operand.vmem [shape: f32[200,1], index: 0, kind: input, shape index: {}]   ;;  %s1068_s1 = inlined_call_operand.vmem [shape: f32[1,64], index: 1, kind: input, shape index: {}]   ;;  %s1069_s2 = inlined_call_operand.hbm [shape: f32[200,128], index: 2, kind: output, shape index: {}]  }
   0x1   :  { %9 = vsyncpa [#allocation3 + $0x1], 0  ;;  %s721_s9 = smov 0   ;;  %s723_s10 = smov 0  }
   0x2   :  { %s725_s11 = smov 0   ;;  %s727_s12 = smov 0  }
   0x3 LB: > { %s742_s13 = sadd.s32 4294967295, %s699_s12   ;;  %s566_s14 = sadd.s32 4294967294, %s699_s12   ;;  %s699_s12 = sphi %s727_s12, %s1091_s12   ;;  %s695_s11 = sphi %s725_s11, %s1090_s11   ;;  %s691_s10 = sphi %s723_s10, %s1089_s10   ;;  %s687_s9 = sphi %s721_s9, %s1088_s9  }
   0x4   : > { %s746_s15 = sadd.s32 1, %s699_s12   ;;  %s69_s16 = sadd.s32 1, %s695_s11 }
   0x5   : > { %s66_s17 = ssub.s32 %s699_s12, %s746_s15  ;;  %p79_p0 = scmp.ne.s32.totalorder %s695_s11, %s691_s10 }
   0x6   : > { %p67_p1 = scmp.eq.s32.totalorder %s66_s17, 0  ;;  %p80_p2 = scmp.eq.s32.totalorder %s742_s13, 4 }
   0x7   : > { %p85_p3 = scmp.ne.s32.totalorder %s691_s10, %s687_s9  ;;  %p86_p4 = scmp.eq.s32.totalorder %s566_s14, 4 }
   0x8   : > { %s757_s18 = scalar_select %p67_p1, %s695_s11, %s69_s16  }
   0x9   : > { %p759_p5 = por %p80_p2, %p79_p0  ;;  %p763_p6 = por %p86_p4, %p85_p3 }
   0xa   : > { %p569_p7 = scmp.ge.s32.totalorder %s699_s12, 1  ;;  %p124_p8 = scmp.lt.s32.totalorder %s699_s12, 6 }
   0xc   : > { %p125_p9 = pnand %p569_p7, %p124_p8 }
   0xd   : > { %s770_s21 = smul.u32 (!%p125_p9), 6, %s742_s13  ;;  %v701_v0 = vmov (!%p125_p9), 0   ;;  %v571_v7 = vld [vmem:[%s1068_s1] ss:$0 sm:$0xff] (!%p125_p9)  ;;  %s147_s29 = sand.u32 (!%p125_p9), 1, %s691_s10   ;;  %vm446_vm7 = vcmask (!%p125_p9), 523264  }
   0xe   : > { %128 = sbr.rel (%p125_p9) target bundleno = 366 (0x16e), region = 28  ;;  %636 = vset.pattern.permute.xlu1 (!%p125_p9), %v701_v0  ;;  %635 = vset.pattern.permute.xlu0 (!%p125_p9), %v701_v0  ;;  %s702_s30 = smov (!%p125_p9), 64  }
   0xf   : > { %p155_p10 = scmp.lt.s32.totalorder (!%p125_p9), %s770_s21, 24  ;;  %s580_s3 = smul.u32 (!%p125_p9), 48, %s147_s29 }
  0x10   : > { %s1006_s5 = scalar_lea.sflag (!%p125_p9), [#allocation3], %s147_s29 }
  0x11   : > { %s973_s4 = scalar_lea.vmem (!%p125_p9), [#allocation2], %s580_s3 }
  0x15   : > { %s156_s22 = scalar_select %p155_p10, %s770_s21, 24 }
  0x16   : > { %s493_s6 = ssub.s32 (%p759_p5), 25, %s770_s21 }
  0x17   : > { %s570_s23 = sshll.u32 %s156_s22, 3  ;;  %p494_p11 = scmp.lt.s32.totalorder (%p759_p5), %s493_s6, 6 }
  0x18   : > { %s158_s26 = scalar_lea.vmem %s1067_s0, %s570_s23 }
  0x19   : > { %v171_v1 = vld [vmem:[%s158_s26 + $0x10] sm:$0xff]  ;;  %v169_v2 = vld [vmem:[%s158_s26] sm:$0xff]  ;;  %v172_v3 = vld [vmem:[%s158_s26 + $0x18] sm:$0xff] }
  0x1a   : > { %188 = vperm.xlu1 %636, %v171_v1   ;;  %178 = vperm.xlu0 %635, %v169_v2   ;;  %v170_v4 = vld [vmem:[%s158_s26 + $0x8] sm:$0xff]  ;;  %v173_v6 = vld [vmem:[%s158_s26 + $0x20] sm:$0xff] }
  0x1b   : > { %v174_v5 = vld [vmem:[%s158_s26 + $0x28] sm:$0xff] }
  0x1e   : > { %193 = vperm.xlu1 %636, %v172_v3   ;;  %183 = vperm.xlu0 %635, %v170_v4  }
  0x22   : > { %203 = vperm.xlu1 %636, %v174_v5   ;;  %198 = vperm.xlu0 %635, %v173_v6  }
  0x99   : > { %v189_v8 = vpop.permute.xlu1 %188  ;;  %v179_v9 = vpop.permute.xlu0 %178 }
  0x9a   : > { %v214_v10 = vmul.f32 %v571_v7, %v189_v8  ;;  %v212_v11 = vmul.f32 %v571_v7, %v179_v9 }
  0x9c   : > { %v220_v12 = vmul.f32 0.63661975, %v214_v10  ;;  %v218_v13 = vmul.f32 0.63661975, %v212_v11 }
  0x9d   : > { %v194_v14 = vpop.permute.xlu1 %193  ;;  %v184_v15 = vpop.permute.xlu0 %183 }
  0x9e   : > { %v226_v16 = vadd.f32 0.5, %v220_v12  ;;  %v224_v17 = vadd.f32 0.5, %v218_v13  ;;  %v215_v18 = vmul.f32 %v571_v7, %v194_v14  ;;  %v213_v19 = vmul.f32 %v571_v7, %v184_v15 }
  0xa0   : > { %v232_v20 = vfloor.f32 %v226_v16  ;;  %v230_v21 = vfloor.f32 %v224_v17  ;;  %v221_v22 = vmul.f32 0.63661975, %v215_v18  ;;  %v219_v23 = vmul.f32 0.63661975, %v213_v19 }
  0xa1   : > { %v204_v24 = vpop.permute.xlu1 %203  ;;  %v199_v31 = vpop.permute.xlu0 %198 }
  0xa2   : > { %v238_v25 = vmul.f32 1.5707855, %v232_v20  ;;  %v250_v26 = vmul.f32 1.0804334e-05, %v232_v20  ;;  %v585_v27 = vtrunc.f32 %v232_v20  ;;  %v236_v28 = vmul.f32 1.5707855, %v230_v21 }
  0xa3   : > { %v227_v29 = vadd.f32 0.5, %v221_v22  ;;  %v225_v30 = vadd.f32 0.5, %v219_v23  ;;  %v248_v34 = vmul.f32 1.0804334e-05, %v230_v21  ;;  %v217_v35 = vmul.f32 %v571_v7, %v204_v24 }
  0xa4   : > { %v244_v32 = vsub.f32 %v214_v10, %v238_v25  ;;  %v242_v33 = vsub.f32 %v212_v11, %v236_v28  ;;  %v780_v36 = vcvt.f32.s32 %v585_v27  ;;  %v581_v37 = vtrunc.f32 %v230_v21 }
  0xa5   : > { %v233_v38 = vfloor.f32 %v227_v29  ;;  %v231_v39 = vfloor.f32 %v225_v30  ;;  %v223_v42 = vmul.f32 0.63661975, %v217_v35  ;;  %v216_v43 = vmul.f32 %v571_v7, %v199_v31 }
  0xa6   : > { %v782_v40 = vsub.f32 %v244_v32, %v250_v26  ;;  %v784_v41 = vsub.f32 %v242_v33, %v248_v34  ;;  %v792_v55 = vcvt.f32.s32 %v581_v37  ;;  %v370_v57 = vand.u32 1, %v780_v36 }
  0xa7   : > { %v239_v44 = vmul.f32 1.5707855, %v233_v38  ;;  %v251_v45 = vmul.f32 1.0804334e-05, %v233_v38  ;;  %v237_v46 = vmul.f32 1.5707855, %v231_v39  ;;  %v587_v49 = vtrunc.f32 %v233_v38 }
  0xa8   : > { %v788_v47 = vmul.f32 %v782_v40, %v782_v40  ;;  %v260_v48 = vmul.f32 %v784_v41, %v784_v41  ;;  %v249_v50 = vmul.f32 1.0804334e-05, %v231_v39  ;;  %v583_v53 = vtrunc.f32 %v231_v39 }
  0xa9   : > { %v245_v51 = vsub.f32 %v215_v18, %v239_v44  ;;  %v243_v52 = vsub.f32 %v213_v19, %v237_v46  ;;  %v229_v54 = vadd.f32 0.5, %v223_v42  ;;  %v222_v56 = vmul.f32 0.63661975, %v216_v43 }
  0xaa   : > { %v272_v61 = vmul.f32 -0.00019515296, %v260_v48  ;;  %v799_v62 = vcvt.f32.s32 %v587_v49  ;;  %v308_v0 = vmul.f32 0.5, %v260_v48  ;;  %v326_v1 = vmul.f32 2.4433157e-05, %v260_v48 }
  0xab   : > { %v795_v58 = vsub.f32 %v245_v51, %v251_v45  ;;  %v797_v59 = vsub.f32 %v243_v52, %v249_v50  ;;  %v235_v60 = vfloor.f32 %v229_v54  ;;  %v228_v63 = vadd.f32 0.5, %v222_v56 }
  0xac   : > { %v268_v2 = vmul.f32 %v788_v47, %v782_v40  ;;  %v266_v3 = vmul.f32 %v260_v48, %v784_v41  ;;  %v804_v4 = vcvt.f32.s32 %v583_v53  ;;  %v278_v8 = vadd.f32 0.008332161, %v272_v61 }
  0xad   : > { %v241_v5 = vmul.f32 1.5707855, %v235_v60  ;;  %v808_v6 = vmul.f32 %v795_v58, %v795_v58  ;;  %v234_v7 = vfloor.f32 %v228_v63  ;;  %v320_v9 = vmul.f32 %v260_v48, %v260_v48 }
  0xae   : > { %v812_v10 = vmul.f32 %v797_v59, %v797_v59  ;;  %v253_v12 = vmul.f32 1.0804334e-05, %v235_v60  ;;  %v332_v13 = vadd.f32 -0.0013887316, %v326_v1  ;;  %v591_v14 = vtrunc.f32 %v235_v60 }
  0xaf   : > { %v247_v11 = vsub.f32 %v217_v35, %v241_v5  ;;  %v240_v15 = vmul.f32 1.5707855, %v234_v7  ;;  %v589_v16 = vtrunc.f32 %v234_v7  ;;  %v314_v17 = vsub.f32 1.0, %v308_v0 }
  0xb0   : > { %v284_v19 = vmul.f32 %v278_v8, %v260_v48  ;;  %v338_v20 = vmul.f32 %v332_v13, %v260_v48  ;;  %v368_v21 = vand.u32 1, %v792_v55  ;;  %v252_v23 = vmul.f32 1.0804334e-05, %v234_v7 }
  0xb1   : > { %v815_v18 = vsub.f32 %v247_v11, %v253_v12  ;;  %v246_v22 = vsub.f32 %v216_v43, %v240_v15  ;;  %v416_v24 = vadd.s32 1, %v792_v55  ;;  %v274_v25 = vmul.f32 -0.00019515296, %v788_v47 }
  0xb2   : > { %v822_v26 = vmul.f32 %v808_v6, %v795_v58  ;;  %v290_v28 = vadd.f32 -0.16666655, %v284_v19  ;;  %v344_v29 = vadd.f32 0.041666646, %v338_v20  ;;  %v267_v30 = vmul.f32 %v812_v10, %v797_v59 }
  0xb3   : > { %v826_v27 = vmul.f32 %v815_v18, %v815_v18  ;;  %v830_v31 = vcvt.f32.s32 %v591_v14  ;;  %v832_v32 = vsub.f32 %v246_v22, %v252_v23  ;;  %v280_v33 = vadd.f32 0.008332161, %v274_v25 }
  0xb4   : > { %v834_v34 = vcvt.f32.s32 %v589_v16  ;;  %v296_v35 = vmul.f32 %v290_v28, %v266_v3  ;;  %v350_v37 = vmul.f32 %v344_v29, %v320_v9  ;;  %vm374_vm0 = vcmp.ne.s32.totalorder %v368_v21, 0 }
  0xb5   : > { %v838_v38 = vmul.f32 %v826_v27, %v815_v18  ;;  %v422_v39 = vand.u32 2, %v416_v24  ;;  %v286_v42 = vmul.f32 %v280_v33, %v788_v47  ;;  %v310_v43 = vmul.f32 0.5, %v788_v47 }
  0xb6   : > { %v302_v44 = vadd.f32 %v296_v35, %v784_v41  ;;  %v356_v45 = vadd.f32 %v350_v37, %v314_v17  ;;  %v322_v46 = vmul.f32 %v788_v47, %v788_v47  ;;  %v328_v48 = vmul.f32 2.4433157e-05, %v788_v47 }
  0xb7   : > { %v848_v49 = vmul.f32 %v832_v32, %v832_v32  ;;  %v292_v50 = vadd.f32 -0.16666655, %v286_v42  ;;  %v418_v51 = vadd.s32 1, %v780_v36  ;;  %v273_v52 = vmul.f32 -0.00019515296, %v812_v10 }
  0xb8   : > { %v386_v53 = vsel %vm374_vm0, %v302_v44, %v356_v45  ;;  %v852_v54 = vsel %vm374_vm0, %v356_v45, %v302_v44  ;;  %v334_v56 = vadd.f32 -0.0013887316, %v328_v48  ;;  %v309_v41 = vmul.f32 0.5, %v812_v10 }
  0xb9   : > { %vm428_vm1 = vcmp.ne.s32.totalorder %v422_v39, 0  ;;  %v434_v60 = vsub.f32 0.0, %v386_v53  ;;  %v298_v61 = vmul.f32 %v292_v50, %v268_v2  ;;  %v316_v63 = vsub.f32 1.0, %v310_v43 }
  0xba   : > { %v340_v0 = vmul.f32 %v334_v56, %v788_v47  ;;  %vm858_vm2 = vcmp.ne.s32.totalorder %v370_v57, 0  ;;  %v424_v3 = vand.u32 2, %v418_v51  ;;  %v279_v5 = vadd.f32 0.008332161, %v273_v52 }
  0xbb   : > { %v864_v7 = vmul.f32 %v848_v49, %v832_v32  ;;  %v440_v8 = vsel %vm428_vm1, %v434_v60, %v386_v53  ;;  %v404_v9 = vsub.f32 0.0, %v852_v54  ;;  %v327_v2 = vmul.f32 2.4433157e-05, %v812_v10 }
  0xbc   : > { %459 = vrot.lane.b32.xlu0 %v440_v8, %s702_s30  ;;  %v346_v47 = vadd.f32 0.041666646, %v340_v0  ;;  %v285_v57 = vmul.f32 %v279_v5, %v812_v10  ;;  %v315_v11 = vsub.f32 1.0, %v309_v41  ;;  %v417_v12 = vadd.s32 1, %v804_v4 }
  0xbd   : > { %v304_v13 = vadd.f32 %v298_v61, %v782_v40  ;;  %v321_v14 = vmul.f32 %v812_v10, %v812_v10  ;;  %v333_v15 = vadd.f32 -0.0013887316, %v327_v2  ;;  %v275_v16 = vmul.f32 -0.00019515296, %v808_v6 }
  0xbe   : > { %v352_v17 = vmul.f32 %v346_v47, %v322_v46  ;;  %vm875_vm3 = vcmp.ne.s32.totalorder %v424_v3, 0  ;;  %v291_v20 = vadd.f32 -0.16666655, %v285_v57  ;;  %v369_v21 = vand.u32 1, %v804_v4 }
  0xbf   : > { %v339_v22 = vmul.f32 %v333_v15, %v812_v10  ;;  %v281_v23 = vadd.f32 0.008332161, %v275_v16  ;;  %v311_v24 = vmul.f32 0.5, %v808_v6  ;;  %v329_v40 = vmul.f32 2.4433157e-05, %v808_v6 }
  0xc0   : > { %v358_v25 = vadd.f32 %v352_v17, %v316_v63  ;;  %v297_v28 = vmul.f32 %v291_v20, %v267_v30  ;;  %v423_v29 = vand.u32 2, %v417_v12  ;;  %v323_v33 = vmul.f32 %v808_v6, %v808_v6 }
  0xc1   : > { %v345_v35 = vadd.f32 0.041666646, %v339_v22  ;;  %v287_v37 = vmul.f32 %v281_v23, %v808_v6  ;;  %v335_v39 = vadd.f32 -0.0013887316, %v329_v40  ;;  %v371_v42 = vand.u32 1, %v799_v62 }
  0xc2   : > { %v889_v10 = vsel %vm858_vm2, %v358_v25, %v304_v13  ;;  %v388_v43 = vsel %vm858_vm2, %v304_v13, %v358_v25  ;;  %vm893_vm4 = vcmp.ne.s32.totalorder %v369_v21, 0  ;;  %v419_v30 = vadd.s32 1, %v799_v62 }
  0xc3   : > { %v436_v45 = vsub.f32 0.0, %v388_v43  ;;  %v303_v46 = vadd.f32 %v297_v28, %v797_v59  ;;  %v351_v48 = vmul.f32 %v345_v35, %v321_v14  ;;  %v293_v50 = vadd.f32 -0.16666655, %v287_v37 }
  0xc4   : > { %vm899_vm5 = vcmp.ne.s32.totalorder %v423_v29, 0  ;;  %v317_v52 = vsub.f32 1.0, %v311_v24  ;;  %v341_v53 = vmul.f32 %v335_v39, %v808_v6  ;;  %v276_v56 = vmul.f32 -0.00019515296, %v848_v49 }
  0xc5   : > { %v442_v41 = vsel %vm875_vm3, %v436_v45, %v388_v43  ;;  %v357_v60 = vadd.f32 %v351_v48, %v315_v11  ;;  %v299_v61 = vmul.f32 %v293_v50, %v822_v26  ;;  %vm908_vm6 = vcmp.ne.s32.totalorder %v371_v42, 0 }
  0xc6   : > { %v406_v59 = vsub.f32 0.0, %v889_v10  ;;  %463 = vrot.lane.b32.xlu0 %v442_v41, %s702_s30  ;;  %v347_v0 = vadd.f32 0.041666646, %v341_v53  ;;  %v425_v1 = vand.u32 2, %v419_v30  ;;  %v282_v3 = vadd.f32 0.008332161, %v276_v56 }
  0xc7   : > { %v387_v6 = vsel %vm893_vm4, %v303_v46, %v357_v60  ;;  %v381_v5 = vsel %vm893_vm4, %v357_v60, %v303_v46  ;;  %v312_v8 = vmul.f32 0.5, %v848_v49  ;;  %v330_v26 = vmul.f32 2.4433157e-05, %v848_v49 }
  0xc8   : > { %v435_v2 = vsub.f32 0.0, %v387_v6  ;;  %v305_v47 = vadd.f32 %v299_v61, %v795_v58  ;;  %v353_v57 = vmul.f32 %v347_v0, %v323_v33  ;;  %v288_v11 = vmul.f32 %v282_v3, %v848_v49 }
  0xc9   : > { %v336_v12 = vadd.f32 -0.0013887316, %v330_v26  ;;  %v372_v13 = vand.u32 1, %v834_v34  ;;  %v420_v14 = vadd.s32 1, %v834_v34  ;;  %v277_v15 = vmul.f32 -0.00019515296, %v826_v27 }
  0xca   : > { %v441_v16 = vsel %vm899_vm5, %v435_v2, %v387_v6  ;;  %v359_v17 = vadd.f32 %v353_v57, %v317_v52  ;;  %v294_v19 = vadd.f32 -0.16666655, %v288_v11  ;;  %v313_v20 = vmul.f32 0.5, %v826_v27 }
  0xcb   : > { %461 = vrot.lane.b32.xlu1 %v441_v16, %s702_s30  ;;  %vm929_vm8 = vcmp.ne.s32.totalorder %v425_v1, 0  ;;  %v324_v21 = vmul.f32 %v848_v49, %v848_v49  ;;  %v342_v22 = vmul.f32 %v336_v12, %v848_v49  ;;  %v283_v23 = vadd.f32 0.008332161, %v277_v15 }
  0xcc   : > { %v383_v24 = vsel %vm908_vm6, %v359_v17, %v305_v47  ;;  %v389_v40 = vsel %vm908_vm6, %v305_v47, %v359_v17  ;;  %v300_v25 = vmul.f32 %v294_v19, %v864_v7  ;;  %v318_v28 = vsub.f32 1.0, %v312_v8 }
  0xcd   : > { %v405_v29 = vsub.f32 0.0, %v381_v5  ;;  %v437_v33 = vsub.f32 0.0, %v389_v40  ;;  %v348_v35 = vadd.f32 0.041666646, %v342_v22  ;;  %v426_v37 = vand.u32 2, %v420_v14 }
  0xce   : > { %vm943_vm9 = vcmp.ne.s32.totalorder %v372_v13, 0  ;;  %v289_v49 = vmul.f32 %v283_v23, %v826_v27  ;;  %v319_v42 = vsub.f32 1.0, %v313_v20  ;;  %v331_v43 = vmul.f32 2.4433157e-05, %v826_v27 }
  0xcf   : > { %v407_v44 = vsub.f32 0.0, %v383_v24  ;;  %v443_v7 = vsel %vm929_vm8, %v437_v33, %v389_v40  ;;  %v306_v30 = vadd.f32 %v300_v25, %v832_v32  ;;  %v354_v45 = vmul.f32 %v348_v35, %v324_v21 }
  0xd0   : > { %465 = vrot.lane.b32.xlu1 %v443_v7, %s702_s30  ;;  %v295_v46 = vadd.f32 -0.16666655, %v289_v49  ;;  %v337_v48 = vadd.f32 -0.0013887316, %v331_v43  ;;  %v392_v50 = vand.u32 2, %v792_v55  ;;  %v393_v51 = vand.u32 2, %v804_v4 }
  0xd1   : > { %v360_v52 = vadd.f32 %v354_v45, %v318_v28  ;;  %vm955_vm10 = vcmp.ne.s32.totalorder %v426_v37, 0  ;;  %v325_v56 = vmul.f32 %v826_v27, %v826_v27  ;;  %v394_v41 = vand.u32 2, %v780_v36 }
  0xd2   : > { %v301_v32 = vmul.f32 %v295_v46, %v838_v38  ;;  %v343_v60 = vmul.f32 %v337_v48, %v826_v27  ;;  %v373_v61 = vand.u32 1, %v830_v31  ;;  %vm398_vm11 = vcmp.ne.s32.totalorder %v392_v50, 0 }
  0xd3   : > { %v390_v55 = vsel %vm943_vm9, %v306_v30, %v360_v52  ;;  %v384_v4 = vsel %vm943_vm9, %v360_v52, %v306_v30  ;;  %v421_v63 = vadd.s32 1, %v830_v31  ;;  %v410_v0 = vsel %vm398_vm11, %v404_v9, %v852_v54 }
  0xd4   : > { %v438_v36 = vsub.f32 0.0, %v390_v55  ;;  %v408_v1 = vsub.f32 0.0, %v384_v4  ;;  %v349_v38 = vadd.f32 0.041666646, %v343_v60  ;;  %447 = vst.msk [vmem:[%s973_s4] sm:$0xff] %vm446_vm7, %v410_v0  ;;  %vm399_vm12 = vcmp.ne.s32.totalorder %v393_v51, 0 }
  0xd5   : > { %v411_v27 = vsel %vm399_vm12, %v405_v29, %v381_v5  ;;  %vm400_vm13 = vcmp.ne.s32.totalorder %v394_v41, 0  ;;  %v395_v3 = vand.u32 2, %v799_v62  ;;  %v396_v6 = vand.u32 2, %v834_v34 }
  0xd6   : > { %v444_v54 = vsel %vm955_vm10, %v438_v36, %v390_v55  ;;  %v307_v9 = vadd.f32 %v301_v32, %v815_v18  ;;  %v355_v8 = vmul.f32 %v349_v38, %v325_v56  ;;  %448 = vst.msk [vmem:[%s973_s4 + $0x8] sm:$0xff] %vm446_vm7, %v411_v27  ;;  %v412_v26 = vsel %vm400_vm13, %v406_v59, %v889_v10 }
  0xd7   : > { %467 = vrot.lane.b32.xlu0 %v444_v54, %s702_s30  ;;  %v427_v5 = vand.u32 2, %v421_v63  ;;  %449 = vst.msk [vmem:[%s973_s4 + $0x10] sm:$0xff] %vm446_vm7, %v412_v26  ;;  %vm401_vm14 = vcmp.ne.s32.totalorder %v395_v3, 0  ;;  %vm402_vm15 = vcmp.ne.s32.totalorder %v396_v6, 0  ;;  %v397_v18 = vand.u32 2, %v830_v31 }
  0xd8   : > { %v361_v62 = vadd.f32 %v355_v8, %v319_v42  ;;  %v413_v34 = vsel %vm401_vm14, %v407_v44, %v383_v24  ;;  %v414_v2 = vsel %vm402_vm15, %v408_v1, %v384_v4  ;;  %vm379_vm0 = vcmp.ne.s32.totalorder %v373_v61, 0 }
  0xd9   : > { %450 = vst.msk [vmem:[%s973_s4 + $0x18] sm:$0xff] %vm446_vm7, %v413_v34  ;;  %451 = vst.msk [vmem:[%s973_s4 + $0x20] sm:$0xff] %vm446_vm7, %v414_v2  ;;  %vm433_vm1 = vcmp.ne.s32.totalorder %v427_v5, 0  ;;  %vm403_vm2 = vcmp.ne.s32.totalorder %v397_v18, 0  ;;  %vm477_vm3 = vcmask 1048064  }
  0xda   : > { %v385_v10 = vsel %vm379_vm0, %v361_v62, %v307_v9  ;;  %v391_v59 = vsel %vm379_vm0, %v307_v9, %v361_v62 }
  0xdb   : > { %v409_v47 = vsub.f32 0.0, %v385_v10  ;;  %v439_v57 = vsub.f32 0.0, %v391_v59 }
  0xdd   : > { %v445_v11 = vsel %vm433_vm1, %v439_v57, %v391_v59  ;;  %v415_v12 = vsel %vm403_vm2, %v409_v47, %v385_v10 }
  0xde   : > { %469 = vrot.lane.b32.xlu1 %v445_v11, %s702_s30  ;;  %452 = vst.msk [vmem:[%s973_s4 + $0x28] sm:$0xff] %vm446_vm7, %v415_v12 }
 0x12e   : > { %v460_v31 = vpop.permute.xlu0 %459 }
 0x12f   : > { %478 = vst.msk [vmem:[%s973_s4] sm:$0xff] %vm477_vm3, %v460_v31 }
 0x138   : > { %v464_v13 = vpop.permute.xlu0 %463 }
 0x139   : > { %480 = vst.msk [vmem:[%s973_s4 + $0x10] sm:$0xff] %vm477_vm3, %v464_v13 }
 0x13d   : > { %v462_v14 = vpop.permute.xlu1 %461 }
 0x13e   : > { %479 = vst.msk [vmem:[%s973_s4 + $0x8] sm:$0xff] %vm477_vm3, %v462_v14 }
 0x142   : > { %v466_v15 = vpop.permute.xlu1 %465 }
 0x143   : > { %481 = vst.msk [vmem:[%s973_s4 + $0x18] sm:$0xff] %vm477_vm3, %v466_v15 }
 0x149   : > { %v468_v16 = vpop.permute.xlu0 %467 }
 0x14a   : > { %482 = vst.msk [vmem:[%s973_s4 + $0x20] sm:$0xff] %vm477_vm3, %v468_v16 }
 0x14b   : > { %491 = sbr.rel (!%p759_p5) target bundleno = 366 (0x16e), region = 32 }
 0x150   : > { %v470_v17 = vpop.permute.xlu1 %469 }
 0x151   : > { %483 = vst.msk [vmem:[%s973_s4 + $0x28] sm:$0xff] %vm477_vm3, %v470_v17 }
 0x152   : > { %s1093_s6 = smov (!%p494_p11, %s493_s6), 6 }
 0x153   : > { %s1011_s7 = sshll.u32 %s1093_s6, 7 }
 0x154   : > { %s498_s8 = ssub.s32 768, %s1011_s7 }
 0x155   : > { %499 = vsyncadd %s1006_s5, %s498_s8  ;;  %p573_p12 = scmp.ne.s32.totalorder %s1011_s7, 0  ;;  %s579_s14 = smul.u32 768, %s742_s13 }
 0x156   : > { %s504_s16 = sshll.u32 %s973_s4, 4  ;;  %s703_s23 = smov [#allocation2]   ;;  %s1023_s16 = int_to_ptr.vmem [resolvable:$true] %s504_s16 }
 0x157   : > { %s1021_s22 = scalar_lea.hbm %s1069_s2, %s579_s14  ;;  %s637_s21 = scalar_lea.vmem %s1023_s16, %s1011_s7 }
 0x158   : > { %p638_p13 = scmp.ne.s32.totalorder %s1023_s16, %s637_s21  ;;  %s641_s24 = sshll.u32 %s703_s23, 4  ;;  %s642_s24 = int_to_ptr.vmem [resolvable:$false] %s641_s24 }
 0x159   : > { %s643_s13 = scalar_lea.vmem %s642_s24, 1536  ;;  %p644_p2 = scmp.lt.s32.totalorder %s1023_s16, %s642_s24 }
 0x15a   : > { %p639_p0 = pnand %p638_p13, %p573_p12  ;;  %p645_p3 = scmp.lt.s32.totalorder %s643_s13, %s637_s21 }
 0x15c   : > { %p640_p1 = pneg %p639_p0  ;;  %p646_p4 = por %p645_p3, %p644_p2 }
 0x15e   : > { %p647_p5 = pnand %p646_p4, %p640_p1 }
 0x160   : > { %650 = shalt.err (!%p647_p5)
}
 0x161   : > { %s651_s25 = scalar_lea.hbm %s1021_s22, %s1011_s7  ;;  %s655_s28 = scalar_lea.hbm %s1069_s2, 3200 }
 0x162   : > { %p652_p7 = scmp.ne.s32.totalorder %s1021_s22, %s651_s25  ;;  %p656_p10 = scmp.lt.u32.totalorder %s1021_s22, %s1069_s2 }
 0x163   : > { %p657_p11 = scmp.lt.u32.totalorder %s655_s28, %s651_s25  ;;  %p659_p0 = scmp.lt.u32.totalorder %s651_s25, %s1021_s22 }
 0x164   : > { %p653_p8 = pnand %p652_p7, %p573_p12 }
 0x165   : > { %p658_p13 = por %p657_p11, %p656_p10 }
 0x166   : > { %p654_p9 = pneg %p653_p8 }
 0x167   : > { %p660_p1 = por %p659_p0, %p658_p13 }
 0x169   : > { %p661_p2 = pnand %p660_p1, %p654_p9 }
 0x16b   : > { %664 = shalt.err (!%p661_p2)
}
 0x16c   : > { %s704_s3 = smov 128   ;;  %s705_s4 = smov 8  }
 0x16d   : > { %510 = dma.vmem_to_hbm [thread:$0]  (%p573_p12), %s1023_s16, %s1011_s7, %s1021_s22, %s1006_s5, %s704_s3, %s704_s3, %s705_s4  }
 0x16e PF: > { %p598_p3 = scmp.ge.s32.totalorder %s699_s12, 2  ;;  %s519_s6 = sand.u32 1, %s687_s9  }
 0x16f   : > { %s520_s8 = scalar_lea.sflag [#allocation3], %s519_s6 }
 0x170   : > { %p595_p4 = pnand %p598_p3, %p763_p6 }
 0x172   : > { %682 = dma.done.wait (!%p595_p4), %s520_s8, 768  }
 0x173   : > { %684 = vsyncadd (!%p595_p4), %s520_s8, 4294966528  ;;  %p12_p5 = scmp.ge.s32.totalorder %s746_s15, 7   ;;  %s1088_s9 = smov %s691_s10 }
 0x174   : > { %s1089_s10 = smov %s695_s11  ;;  %s1090_s11 = smov %s757_s18 }
 0x175   : > { %s1091_s12 = smov %s746_s15  ;;  %14 = sbr.rel (!%p12_p5) target bundleno = 3 (0x3), region = 63 }
 0x17c   :  { %525 = vsyncpa [#allocation3], 1 }
 0x17d   :  { %527 = vsyncpa [#allocation3 + $0x1], 1 }

</bundles_post_ra>
